<compile_context>
chip_gen: v7x
topology: tpu7x:2x2x1
jax: 0.10.0
libtpu: 0.0.40
codegen_flags: <defaults>
</compile_context>

<pallas_src>
import functools
import math

import jax
import jax.numpy as jnp
from jax import lax
from jax.experimental import pallas as pl
from jax.experimental.pallas import tpu as pltpu


def _vmem_limit_bytes():
    """Generation-aware scoped-VMEM limit: ~75% of physical, capped at 100 MiB."""
    try:
        cap = int(getattr(pltpu.get_tpu_info(), "vmem_capacity_bytes",
                          64 * 1024 * 1024))
    except Exception:
        cap = 64 * 1024 * 1024
    return int(min(cap * 0.75, 100 * 1024 * 1024))


_VMEM_LIMIT = _vmem_limit_bytes()


def _pick_tile(dim, desired, align):
    """Largest multiple of `align` dividing `dim`, <= `desired`; falls back to
    the full dimension (always a legal full-extent block).  For pathological
    (large, prime) token counts pad M upstream instead of relying on this."""
    if dim <= desired:
        return dim
    best = None
    t = align
    while t <= desired:
        if dim % t == 0:
            best = t
        t += align
    return best if best is not None else dim


# ---------------------------------------------------------------------------
# Dense (full-K, weight resident in VMEM): y = x @ w + b
# ---------------------------------------------------------------------------
def _dense_kernel(x_ref, w_ref, b_ref, o_ref):
    y = jnp.dot(x_ref[...], w_ref[...], preferred_element_type=jnp.float32)
    o_ref[...] = (y + b_ref[...]).astype(o_ref.dtype)


def dense(x, w, b, out_dtype=None, tm=512, tn=512):
    m, k = x.shape
    n = w.shape[1]
    out_dtype = out_dtype if out_dtype is not None else x.dtype
    tm = _pick_tile(m, tm, 16)
    tn = _pick_tile(n, tn, 128)
    grid = (m // tm, n // tn)
    return pl.pallas_call(
        _dense_kernel,
        out_shape=jax.ShapeDtypeStruct((m, n), out_dtype),
        grid=grid,
        in_specs=[pl.BlockSpec((tm, k), lambda i, j: (i, 0)),
                  pl.BlockSpec((k, tn), lambda i, j: (0, j)),
                  pl.BlockSpec((1, tn), lambda i, j: (0, j))],
        out_specs=pl.BlockSpec((tm, tn), lambda i, j: (i, j)),
        compiler_params=pltpu.CompilerParams(
            dimension_semantics=("parallel", "parallel"),
            vmem_limit_bytes=_VMEM_LIMIT),
    )(x, w, b.reshape(1, n).astype(jnp.float32))


# ---------------------------------------------------------------------------
# Fused dense + bias + residual-add + LayerNorm (attention output projection)
# ---------------------------------------------------------------------------
def _dense_add_ln_kernel(x_ref, w_ref, b_ref, r_ref, g_ref, bt_ref, o_ref, *, eps):
    y = jnp.dot(x_ref[...], w_ref[...], preferred_element_type=jnp.float32)
    y = y + b_ref[...] + r_ref[...].astype(jnp.float32)
    mean = jnp.mean(y, axis=-1, keepdims=True)
    var = jnp.mean((y - mean) ** 2, axis=-1, keepdims=True)
    xhat = (y - mean) * lax.rsqrt(var + eps)
    o_ref[...] = (xhat * g_ref[...] + bt_ref[...]).astype(o_ref.dtype)


def dense_add_ln(x, w, b, residual, gamma, beta, eps=1e-12, out_dtype=None,
                 tm=512):
    m, k = x.shape
    n = w.shape[1]
    out_dtype = out_dtype if out_dtype is not None else residual.dtype
    tm = _pick_tile(m, tm, 16)
    grid = (m // tm,)
    return pl.pallas_call(
        functools.partial(_dense_add_ln_kernel, eps=eps),
        out_shape=jax.ShapeDtypeStruct((m, n), out_dtype),
        grid=grid,
        in_specs=[pl.BlockSpec((tm, k), lambda i: (i, 0)),
                  pl.BlockSpec((k, n), lambda i: (0, 0)),
                  pl.BlockSpec((1, n), lambda i: (0, 0)),
                  pl.BlockSpec((tm, n), lambda i: (i, 0)),
                  pl.BlockSpec((1, n), lambda i: (0, 0)),
                  pl.BlockSpec((1, n), lambda i: (0, 0))],
        out_specs=pl.BlockSpec((tm, n), lambda i: (i, 0)),
        compiler_params=pltpu.CompilerParams(
            dimension_semantics=("parallel",),
            vmem_limit_bytes=_VMEM_LIMIT),
    )(x, w, b.reshape(1, n).astype(jnp.float32), residual,
      gamma.reshape(1, n), beta.reshape(1, n))


# ---------------------------------------------------------------------------
# Fully fused FFN: gelu(x @ w1 + b1) @ w2 + b2 + x  -> LayerNorm
# (no HBM round trip of the [tokens, intermediate] activation)
# ---------------------------------------------------------------------------
def _ffn_ln_kernel(x_ref, w1_ref, b1_ref, w2_ref, b2_ref, g_ref, bt_ref, o_ref,
                   *, eps):
    x = x_ref[...]                                          # (tm, H) bf16
    hmid = jnp.dot(x, w1_ref[...], preferred_element_type=jnp.float32)
    hmid = hmid + b1_ref[...]
    hmid = 0.5 * hmid * (1.0 + lax.erf(hmid * (1.0 / math.sqrt(2.0))))  # exact GELU
    y = jnp.dot(hmid.astype(x.dtype), w2_ref[...],
                preferred_element_type=jnp.float32)
    y = y + b2_ref[...] + x.astype(jnp.float32)             # residual = FFN input
    mean = jnp.mean(y, axis=-1, keepdims=True)
    var = jnp.mean((y - mean) ** 2, axis=-1, keepdims=True)
    xhat = (y - mean) * lax.rsqrt(var + eps)
    o_ref[...] = (xhat * g_ref[...] + bt_ref[...]).astype(o_ref.dtype)


def ffn_ln(x, w1, b1, w2, b2, gamma, beta, eps=1e-12, out_dtype=None, tm=256):
    m, h = x.shape
    inter = w1.shape[1]
    out_dtype = out_dtype if out_dtype is not None else x.dtype
    tm = _pick_tile(m, tm, 16)
    grid = (m // tm,)
    return pl.pallas_call(
        functools.partial(_ffn_ln_kernel, eps=eps),
        out_shape=jax.ShapeDtypeStruct((m, h), out_dtype),
        grid=grid,
        in_specs=[pl.BlockSpec((tm, h), lambda i: (i, 0)),
                  pl.BlockSpec((h, inter), lambda i: (0, 0)),
                  pl.BlockSpec((1, inter), lambda i: (0, 0)),
                  pl.BlockSpec((inter, h), lambda i: (0, 0)),
                  pl.BlockSpec((1, h), lambda i: (0, 0)),
                  pl.BlockSpec((1, h), lambda i: (0, 0)),
                  pl.BlockSpec((1, h), lambda i: (0, 0))],
        out_specs=pl.BlockSpec((tm, h), lambda i: (i, 0)),
        compiler_params=pltpu.CompilerParams(
            dimension_semantics=("parallel",),
            vmem_limit_bytes=_VMEM_LIMIT),
    )(x, w1, b1.reshape(1, inter).astype(jnp.float32), w2,
      b2.reshape(1, h).astype(jnp.float32),
      gamma.reshape(1, h), beta.reshape(1, h))


# ---------------------------------------------------------------------------
# Row-tiled LayerNorm (embedding LN)
# ---------------------------------------------------------------------------
def _layernorm_kernel(x_ref, g_ref, b_ref, o_ref, *, eps):
    x = x_ref[...].astype(jnp.float32)
    mean = jnp.mean(x, axis=-1, keepdims=True)
    var = jnp.mean((x - mean) ** 2, axis=-1, keepdims=True)
    xhat = (x - mean) * lax.rsqrt(var + eps)
    o_ref[...] = (xhat * g_ref[...] + b_ref[...]).astype(o_ref.dtype)


def layernorm(x, gamma, beta, eps=1e-12, out_dtype=None, tm=1024):
    m, h = x.shape
    out_dtype = out_dtype if out_dtype is not None else x.dtype
    tm = _pick_tile(m, tm, 16)
    return pl.pallas_call(
        functools.partial(_layernorm_kernel, eps=eps),
        out_shape=jax.ShapeDtypeStruct((m, h), out_dtype),
        grid=(m // tm,),
        in_specs=[pl.BlockSpec((tm, h), lambda i: (i, 0)),
                  pl.BlockSpec((1, h), lambda i: (0, 0)),
                  pl.BlockSpec((1, h), lambda i: (0, 0))],
        out_specs=pl.BlockSpec((tm, h), lambda i: (i, 0)),
        compiler_params=pltpu.CompilerParams(
            dimension_semantics=("parallel",),
            vmem_limit_bytes=_VMEM_LIMIT),
    )(x, gamma.reshape(1, h), beta.reshape(1, h))


# ---------------------------------------------------------------------------
# Fused QKV projection + self-attention.
# Grid = (batch, head_group); BlockSpec slices the Q/K/V weight columns for
# the head group (128-lane aligned when possible), so the [B*S, 3H] QKV slab
# never touches HBM.  Each head's context is written straight to its output
# slice — no concatenate.
# ---------------------------------------------------------------------------
def _qkv_attn_kernel(x_ref, wq_ref, wk_ref, wv_ref, bq_ref, bk_ref, bv_ref,
                     bias_ref, o_ref, *, dh, scale):
    x = x_ref[0]                                        # (S, H) bf16
    bias = bias_ref[0].astype(jnp.float32)              # (1, S) additive mask
    q = jnp.dot(x, wq_ref[...], preferred_element_type=jnp.float32) + bq_ref[...]
    k = jnp.dot(x, wk_ref[...], preferred_element_type=jnp.float32) + bk_ref[...]
    v = jnp.dot(x, wv_ref[...], preferred_element_type=jnp.float32) + bv_ref[...]
    # Fold 1/sqrt(dh) into Q once (S x dg) instead of every (S,S) scores tile.
    q = (q * scale).astype(x.dtype)
    k = k.astype(x.dtype)
    v = v.astype(x.dtype)
    heads_in_group = q.shape[-1] // dh
    for hh in range(heads_in_group):
        sl = slice(hh * dh, (hh + 1) * dh)
        scores = lax.dot_general(q[:, sl], k[:, sl], (((1,), (1,)), ((), ())),
                                 preferred_element_type=jnp.float32)
        scores = scores + bias
        m = jnp.max(scores, axis=-1, keepdims=True)
        p = jnp.exp(scores - m)
        denom = jnp.sum(p, axis=-1, keepdims=True)
        p = p * pl.reciprocal(denom, approx=True)
        ctx = jnp.dot(p.astype(v.dtype), v[:, sl],
                      preferred_element_type=jnp.float32)
        o_ref[0, :, sl] = ctx.astype(o_ref.dtype)       # direct store, no concat


def _heads_per_group(nh, dh):
    """Smallest head count whose lane width is a multiple of 128; otherwise a
    single group covering all heads (full-extent block, always legal)."""
    for g in range(1, nh + 1):
        if nh % g == 0 and (g * dh) % 128 == 0:
            return g
    return nh


def qkv_attention(x, wq, wk, wv, bq, bk, bv, mask_bias, batch, seq, nh, dh,
                  out_dtype):
    hdim = nh * dh
    hpg = _heads_per_group(nh, dh)
    dg = hpg * dh
    groups = nh // hpg
    scale = 1.0 / math.sqrt(dh)
    x3 = x.reshape(batch, seq, hdim)                    # contiguous (free)
    out = pl.pallas_call(
        functools.partial(_qkv_attn_kernel, dh=dh, scale=scale),
        out_shape=jax.ShapeDtypeStruct((batch, seq, hdim), out_dtype),
        grid=(batch, groups),
        in_specs=[pl.BlockSpec((1, seq, hdim), lambda b, g: (b, 0, 0)),
                  pl.BlockSpec((hdim, dg), lambda b, g: (0, g)),
                  pl.BlockSpec((hdim, dg), lambda b, g: (0, g)),
                  pl.BlockSpec((hdim, dg), lambda b, g: (0, g)),
                  pl.BlockSpec((1, dg), lambda b, g: (0, g)),
                  pl.BlockSpec((1, dg), lambda b, g: (0, g)),
                  pl.BlockSpec((1, dg), lambda b, g: (0, g)),
                  pl.BlockSpec((1, 1, seq), lambda b, g: (b, 0, 0))],
        out_specs=pl.BlockSpec((1, seq, dg), lambda b, g: (b, 0, g)),
        compiler_params=pltpu.CompilerParams(
            dimension_semantics=("parallel", "parallel"),
            vmem_limit_bytes=_VMEM_LIMIT),
    )(x3, wq, wk, wv,
      bq.reshape(1, hdim).astype(jnp.float32),
      bk.reshape(1, hdim).astype(jnp.float32),
      bv.reshape(1, hdim).astype(jnp.float32),
      mask_bias)
    return out.reshape(batch * seq, hdim)


# ---------------------------------------------------------------------------
# Parameter init (deterministic, synthetic — no checkpoint loading)
# ---------------------------------------------------------------------------
def init_params(key, cfg):
    h, inter, nl = cfg["hidden"], cfg["intermediate"], cfg["num_labels"]
    nl_pad = ((nl + 127) // 128) * 128          # lane-dense classifier output
    wdtype = jnp.bfloat16

    def nrm(k, shape):
        return (0.02 * jax.random.normal(k, shape, dtype=jnp.float32)).astype(wdtype)

    keys = iter(jax.random.split(key, 8 + 8 * cfg["layers"]))
    params = {
        "word_emb": nrm(next(keys), (cfg["vocab"], h)),
        "pos_emb": nrm(next(keys), (cfg["max_pos"], h)),
        "type_emb": nrm(next(keys), (cfg["type_vocab"], h)),
        "emb_ln_g": jnp.ones((h,), jnp.float32),
        "emb_ln_b": jnp.zeros((h,), jnp.float32),
        "wc": jnp.pad(nrm(next(keys), (h, nl)), ((0, 0), (0, nl_pad - nl))),
        "bc": jnp.zeros((nl_pad,), jnp.float32),
        "layers": [],
    }
    for _ in range(cfg["layers"]):
        layer = {
            "wq": nrm(next(keys), (h, h)), "bq": jnp.zeros((h,), jnp.float32),
            "wk": nrm(next(keys), (h, h)), "bk": jnp.zeros((h,), jnp.float32),
            "wv": nrm(next(keys), (h, h)), "bv": jnp.zeros((h,), jnp.float32),
            "wo": nrm(next(keys), (h, h)), "bo": jnp.zeros((h,), jnp.float32),
            "ln1_g": jnp.ones((h,), jnp.float32),
            "ln1_b": jnp.zeros((h,), jnp.float32),
            "w1": nrm(next(keys), (h, inter)),
            "b1": jnp.zeros((inter,), jnp.float32),
            "w2": nrm(next(keys), (inter, h)),
            "b2": jnp.zeros((h,), jnp.float32),
            "ln2_g": jnp.ones((h,), jnp.float32),
            "ln2_b": jnp.zeros((h,), jnp.float32),
        }
        params["layers"].append(layer)
    return params


# ---------------------------------------------------------------------------
# Forward pass (mirrors BertForTokenClassificationWrapper.forward)
# ---------------------------------------------------------------------------
def bert_token_classification_wrapper_forward(params, cfg, input_ids,
                                              token_type_ids, attention_mask,
                                              **kwargs):
    # Wrapper semantics: strip trainer-only kwargs, then call model forward.
    for key in ["epoch", "aggregation", "num_items_in_batch", "id"]:
        kwargs.pop(key, None)

    b, s = input_ids.shape
    h, nh, nl = cfg["hidden"], cfg["heads"], cfg["num_labels"]
    dh = h // nh

    # Embedding gathers are glue in plain JAX; LN is the Pallas hot path.
    pos_ids = jnp.arange(s)
    emb = (params["word_emb"][input_ids]
           + params["pos_emb"][pos_ids][None, :, :]
           + params["type_emb"][token_type_ids])
    x = layernorm(emb.reshape(b * s, h).astype(jnp.bfloat16),
                  params["emb_ln_g"], params["emb_ln_b"])

    # Extended attention mask -> additive bias [B, 1, S] (kept in f32).
    mask_bias = ((1.0 - attention_mask.astype(jnp.float32))
                 * -10000.0).reshape(b, 1, s)

    for layer in params["layers"]:
        ctx = qkv_attention(x, layer["wq"], layer["wk"], layer["wv"],
                            layer["bq"], layer["bk"], layer["bv"],
                            mask_bias, b, s, nh, dh, x.dtype)      # [B*S, H]
        x = dense_add_ln(ctx, layer["wo"], layer["bo"], x,
                         layer["ln1_g"], layer["ln1_b"])
        x = ffn_ln(x, layer["w1"], layer["b1"], layer["w2"], layer["b2"],
                   layer["ln2_g"], layer["ln2_b"])

    # TODO(synk): dropout before the classifier is identity in eval mode; omitted.
    logits = dense(x, params["wc"], params["bc"], out_dtype=jnp.float32)
    return logits[:, :nl].reshape(b, s, nl)


# ---------------------------------------------------------------------------
if __name__ == "__main__":
    cfg = dict(vocab=64, hidden=32, heads=2, layers=2, intermediate=64,
               max_pos=16, type_vocab=2, num_labels=3)
    batch, seq = 2, 8

    key = jax.random.PRNGKey(0)
    k_params, k_ids = jax.random.split(key)
    params = init_params(k_params, cfg)

    input_ids = jax.random.randint(k_ids, (batch, seq), 0, cfg["vocab"],
                                   dtype=jnp.int32)
    token_type_ids = jnp.zeros((batch, seq), dtype=jnp.int32)
    attention_mask = jnp.ones((batch, seq), dtype=jnp.int32)

    logits = bert_token_classification_wrapper_forward(
        params, cfg, input_ids, token_type_ids, attention_mask,
        epoch=1, aggregation="mean", num_items_in_batch=batch,
        id=jnp.arange(batch),
    )
    jax.block_until_ready(logits)
    assert logits.shape == (batch, seq, cfg["num_labels"])
    assert bool(jnp.all(jnp.isfinite(logits)))
    print("KERNEL_OK")
</pallas_src>

<mosaic_0001>
module attributes {stable_mosaic.version = 11 : i64} {
  func.func @_layernorm_kernel(%arg0: i32, %arg1: memref<16x32xbf16, #tpu.memory_space<vmem>>, %arg2: memref<1x32xf32, #tpu.memory_space<vmem>>, %arg3: memref<1x32xf32, #tpu.memory_space<vmem>>, %arg4: memref<16x32xbf16, #tpu.memory_space<vmem>>) attributes {dimension_semantics = [#tpu.dimension_semantics<parallel>], iteration_bounds = array<i64: 1>, scalar_prefetch = 0 : i64, scratch_operands = 0 : i64, tpu.core_type = #tpu.core_type<tc>, window_params = [{transform_indices = @transform_0, window_bounds = array<i64: 16, 32>}, {pipeline_mode = #tpu.pipeline_mode<synchronous>, transform_indices = @transform_1, window_bounds = array<i64: 1, 32>}, {pipeline_mode = #tpu.pipeline_mode<synchronous>, transform_indices = @transform_2, window_bounds = array<i64: 1, 32>}, {transform_indices = @transform_3, window_bounds = array<i64: 16, 32>}]} {
    %c0 = arith.constant 0 : index
    %c0_0 = arith.constant 0 : index
    %0 = vector.load %arg1[%c0, %c0_0] : memref<16x32xbf16, #tpu.memory_space<vmem>>, vector<16x32xbf16>
    %1 = arith.extf %0 : vector<16x32xbf16> to vector<16x32xf32>
    %cst = arith.constant dense<0.000000e+00> : vector<16xf32>
    %2 = vector.multi_reduction <add>, %1, %cst [1] : vector<16x32xf32> to vector<16xf32>
    %3 = vector.shape_cast %2 : vector<16xf32> to vector<16x1xf32>
    %cst_1 = arith.constant 3.200000e+01 : f32
    %4 = vector.broadcast %cst_1 : f32 to vector<16x1xf32>
    %5 = arith.divf %3, %4 : vector<16x1xf32>
    %6 = vector.broadcast %5 : vector<16x1xf32> to vector<16x32xf32>
    %7 = arith.subf %1, %6 : vector<16x32xf32>
    %8 = arith.mulf %7, %7 : vector<16x32xf32>
    %cst_2 = arith.constant dense<0.000000e+00> : vector<16xf32>
    %9 = vector.multi_reduction <add>, %8, %cst_2 [1] : vector<16x32xf32> to vector<16xf32>
    %10 = vector.shape_cast %9 : vector<16xf32> to vector<16x1xf32>
    %cst_3 = arith.constant 3.200000e+01 : f32
    %11 = vector.broadcast %cst_3 : f32 to vector<16x1xf32>
    %12 = arith.divf %10, %11 : vector<16x1xf32>
    %13 = vector.broadcast %5 : vector<16x1xf32> to vector<16x32xf32>
    %14 = arith.subf %1, %13 : vector<16x32xf32>
    %cst_4 = arith.constant 9.99999996E-13 : f32
    %15 = vector.broadcast %cst_4 : f32 to vector<16x1xf32>
    %16 = arith.addf %12, %15 : vector<16x1xf32>
    %17 = math.rsqrt %16 : vector<16x1xf32>
    %18 = vector.broadcast %17 : vector<16x1xf32> to vector<16x32xf32>
    %19 = arith.mulf %14, %18 : vector<16x32xf32>
    %c0_5 = arith.constant 0 : index
    %c0_6 = arith.constant 0 : index
    %20 = vector.load %arg2[%c0_5, %c0_6] : memref<1x32xf32, #tpu.memory_space<vmem>>, vector<1x32xf32>
    %21 = vector.broadcast %20 : vector<1x32xf32> to vector<16x32xf32>
    %22 = arith.mulf %19, %21 : vector<16x32xf32>
    %c0_7 = arith.constant 0 : index
    %c0_8 = arith.constant 0 : index
    %23 = vector.load %arg3[%c0_7, %c0_8] : memref<1x32xf32, #tpu.memory_space<vmem>>, vector<1x32xf32>
    %24 = vector.broadcast %23 : vector<1x32xf32> to vector<16x32xf32>
    %25 = arith.addf %22, %24 : vector<16x32xf32>
    %26 = arith.truncf %25 : vector<16x32xf32> to vector<16x32xbf16>
    %c0_9 = arith.constant 0 : index
    %c0_10 = arith.constant 0 : index
    %27 = vector.load %arg4[%c0_9, %c0_10] : memref<16x32xbf16, #tpu.memory_space<vmem>>, vector<16x32xbf16>
    tpu.vector_store %arg4[%c0_9, %c0_10], %26 {strides = array<i32>} : memref<16x32xbf16, #tpu.memory_space<vmem>>, vector<16x32xbf16>,
    return
  }
  func.func @transform_0(%arg0: i32) -> (i32, i32) {
    %c0_i32 = arith.constant 0 : i32
    %c0_i32_0 = arith.constant 0 : i32
    return %arg0, %c0_i32 : i32, i32
  }
  func.func @transform_1(%arg0: i32) -> (i32, i32) {
    %c0_i32 = arith.constant 0 : i32
    %c0_i32_0 = arith.constant 0 : i32
    %c0_i32_1 = arith.constant 0 : i32
    return %c0_i32, %c0_i32_0 : i32, i32
  }
  func.func @transform_2(%arg0: i32) -> (i32, i32) {
    %c0_i32 = arith.constant 0 : i32
    %c0_i32_0 = arith.constant 0 : i32
    %c0_i32_1 = arith.constant 0 : i32
    return %c0_i32, %c0_i32_0 : i32, i32
  }
  func.func @transform_3(%arg0: i32) -> (i32, i32) {
    %c0_i32 = arith.constant 0 : i32
    %c0_i32_0 = arith.constant 0 : i32
    return %arg0, %c0_i32 : i32, i32
  }
}

</mosaic_0001>

<bundles_post_ra>
// kernel: tpu_custom_call.1
= control target key start
LH: loop header
LB: loop body
LE: loop exit
PB: predicated region body
PF: predicated region fallthrough
CT: control target
= control target key end

     0   :  { %8 = vsyncpa [#allocation3], 0  ;;  %s237_s0 = inlined_call_operand.hbm [shape: bf16[16,32], index: 0, kind: input, shape index: {}]   ;;  %s238_s1 = inlined_call_operand.vmem [shape: f32[1,32], index: 1, kind: input, shape index: {}]   ;;  %s239_s2 = inlined_call_operand.vmem [shape: f32[1,32], index: 2, kind: input, shape index: {}]   ;;  %s240_s3 = inlined_call_operand.hbm [shape: bf16[16,32], index: 3, kind: output, shape index: {}]  }
   0x1   :  { %9 = vsyncpa [#allocation4], 0  ;;  %s173_s12 = smov [#allocation2]   ;;  %s125_s16 = scalar_lea.hbm %s237_s0, 128 }
   0x2   :  { %s15_s13 = sshll.u32 %s173_s12, 4  ;;  %p126_p0 = scmp.ne.s32.totalorder %s237_s0, %s125_s16  ;;  %s16_s13 = int_to_ptr.vmem [resolvable:$true] %s15_s13 }
   0x3   :  { %p129_p1 = scmp.lt.u32.totalorder %s125_s16, %s237_s0 }
   0x5   :  { %p131_p2 = pnand %p129_p1, %p126_p0 }
   0x7   :  { %134 = shalt.err (!%p131_p2)
}
   0x8   :  { %s135_s21 = scalar_lea.vmem %s16_s13, 128  ;;  %p140_p4 = scmp.lt.s32.totalorder %s16_s13, %s16_s13 }
   0x9   :  { %p136_p3 = scmp.ne.s32.totalorder %s16_s13, %s135_s21  ;;  %p141_p5 = scmp.lt.s32.totalorder %s135_s21, %s135_s21 }
   0xb   :  { %p142_p6 = por %p141_p5, %p140_p4 }
   0xd   :  { %p143_p7 = pnand %p142_p6, %p136_p3 }
   0xf   :  { %146 = shalt.err (!%p143_p7)
}
  0x10   :  { %s174_s22 = smov 64   ;;  %s175_s23 = smov 4  }
  0x11   :  { %21 = dma.hbm_to_vmem [thread:$0]  %s237_s0, 128, %s16_s13, [#allocation3], %s174_s22, %s174_s22, %s175_s23  }
  0x12   :  { %169 = dma.done.wait [#allocation3], 128  }
  0x13   :  { %170 = vsyncadd [#allocation3], 4294967168  ;;  %v114_v0 = vld [vmem:[#allocation2] sm:$0xff]   ;;  %vm33_vm0 = vcmask 261120   ;;  %vm87_vm1 = vcmask 257024   ;;  %s176_s29 = smov [#allocation5]  }
  0x14   :  { %v115_v1 = vunpack.c.l.bf16 %v114_v0  ;;  %v116_v2 = vunpack.c.h.bf16 %v114_v0  ;;  %v107_v22 = vld [vmem:[%s238_s1] ss:$0 sm:$0xff]  ;;  %s95_s30 = sshll.u32 %s176_s29, 4  ;;  %s96_s30 = int_to_ptr.vmem [resolvable:$true] %s95_s30 }
  0x15   :  { %v108_v24 = vld [vmem:[%s239_s2] ss:$0 sm:$0xff]  ;;  %s147_s1 = scalar_lea.vmem %s96_s30, 128  ;;  %p152_p9 = scmp.lt.s32.totalorder %s96_s30, %s96_s30 }
  0x16   :  { %v34_v3 = vsel %vm33_vm0, %v115_v1, 0.0  ;;  %v37_v4 = vsel %vm33_vm0, %v116_v2, 0.0  ;;  %p148_p8 = scmp.ne.s32.totalorder %s96_s30, %s147_s1  ;;  %p153_p10 = scmp.lt.s32.totalorder %s147_s1, %s147_s1 }
  0x17   :  { %35 = vadd.xlane.f32.xlu0 %v34_v3 }
  0x18   :  { %p154_p11 = por %p153_p10, %p152_p9 }
  0x1a   :  { %p155_p12 = pnand %p154_p11, %p148_p8 }
  0x1b   :  { %38 = vadd.xlane.f32.xlu0 %v37_v4 }
  0xa4   :  { %v36_v5 = vpop.xlane.xlu0 %35 }
  0xa5   :  { %v41_v6 = vmul.f32 0.03125, %v36_v5 }
  0xa7   :  { %v43_v7 = vsub.f32 %v115_v1, %v41_v6 }
  0xa8   :  { %v39_v8 = vpop.xlane.xlu0 %38 }
  0xa9   :  { %v42_v9 = vmul.f32 0.03125, %v39_v8  ;;  %v45_v10 = vmul.f32 %v43_v7, %v43_v7 }
  0xab   :  { %v44_v11 = vsub.f32 %v116_v2, %v42_v9  ;;  %v47_v12 = vsel %vm33_vm0, %v45_v10, 0.0 }
  0xac   :  { %48 = vadd.xlane.f32.xlu1 %v47_v12 }
  0xad   :  { %v46_v13 = vmul.f32 %v44_v11, %v44_v11 }
  0xaf   :  { %v50_v14 = vsel %vm33_vm0, %v46_v13, 0.0 }
  0xb0   :  { %51 = vadd.xlane.f32.xlu1 %v50_v14 }
 0x139   :  { %v49_v15 = vpop.xlane.xlu1 %48 }
 0x13a   :  { %v53_v16 = vmul.f32 0.03125, %v49_v15 }
 0x13c   :  { %v55_v17 = vadd.f32 1e-12, %v53_v16 }
 0x13d   :  { %v52_v18 = vpop.xlane.xlu1 %51 }
 0x13e   :  { %121 = vrsqrt.f32 %v55_v17  ;;  %v54_v19 = vmul.f32 0.03125, %v52_v18 }
 0x140   :  { %v56_v20 = vadd.f32 1e-12, %v54_v19 }
 0x142   :  { %123 = vrsqrt.f32 %v56_v20 }
 0x148   :  { %v122_v21 = vpop.eup %121 }
 0x149   :  { %v59_v23 = vmul.f32 %v122_v21, %v43_v7 }
 0x14b   :  { %v68_v25 = vmul.f32 %v107_v22, %v59_v23 }
 0x14c   :  { %v124_v26 = vpop.eup %123 }
 0x14d   :  { %v60_v27 = vmul.f32 %v124_v26, %v44_v11  ;;  %v77_v28 = vadd.f32 %v108_v24, %v68_v25 }
 0x14f   :  { %v69_v29 = vmul.f32 %v107_v22, %v60_v27  ;;  %v111_v30 = vpack.c.bf16 %v77_v28, %v77_v28 }
 0x151   :  { %v78_v31 = vadd.f32 %v108_v24, %v69_v29  ;;  %88 = vst.msk [vmem:[#allocation5] sm:$0xf] %vm87_vm1, %v111_v30 }
 0x153   :  { %v112_v32 = vpack.c.bf16 %v78_v31, %v78_v31 }
 0x155   :  { %89 = vst.msk [vmem:[#allocation5 + $0x4] sm:$0xf] %vm87_vm1, %v112_v32 }
 0x156   :  { %158 = shalt.err (!%p155_p12)
}
 0x157   :  { %s159_s5 = scalar_lea.hbm %s240_s3, 128 }
 0x158   :  { %p160_p13 = scmp.ne.s32.totalorder %s240_s3, %s159_s5  ;;  %p163_p0 = scmp.lt.u32.totalorder %s159_s5, %s240_s3 }
 0x15a   :  { %p165_p1 = pnand %p163_p0, %p160_p13 }
 0x15c   :  { %168 = shalt.err (!%p165_p1)
}
 0x15d   :  { %101 = dma.vmem_to_hbm [thread:$0]  %s96_s30, 128, %s240_s3, [#allocation4], %s174_s22, %s174_s22, %s175_s23  }
 0x15e   :  { %171 = dma.done.wait [#allocation4], 128  }
 0x15f   :  { %172 = vsyncadd [#allocation4], 4294967168 }
 0x160   :  { %105 = vsyncpa [#allocation3], 1 }
 0x161   :  { %106 = vsyncpa [#allocation4], 1 }

</bundles_post_ra>
